<compile_context>
chip_gen: v7x
topology: tpu7x:2x2x1
jax: 0.10.0
libtpu: 0.0.40
codegen_flags: <defaults>
</compile_context>

<pallas_src>
import jax
import jax.numpy as jnp
import numpy as np
from jax.experimental import pallas as pl
from jax.experimental.pallas import tpu as pltpu


def _mha_kernel(xq_ref, xk_ref, xv_ref, mask_ref,
                wq_ref, bq_ref, wk_ref, bk_ref, wv_ref, bv_ref,
                wo_ref, bo_ref, gamma_ref, beta_ref,
                out_ref, attn_ref, acc_ref):
    f32 = jnp.float32
    bf16 = jnp.bfloat16

    Bt, S, D = xq_ref.shape                # batch block, sequence, d_model
    d_K = wq_ref.shape[2]
    d_V = wv_ref.shape[2]
    h = pl.program_id(1)
    last_h = pl.num_programs(1) - 1

    # ---- per-head projections: plain (Bt*S, D) @ (D, d) matmuls, no transposes.
    xq = xq_ref[...].reshape(Bt * S, D)                       # f32 (residual too)
    xk = xk_ref[...].reshape(Bt * S, D)                       # bf16 (cast in wrapper)
    xv = xv_ref[...].reshape(Bt * S, D)                       # bf16

    # W_Q / b_Q arrive pre-scaled by 1/sqrt(d_K) (folded in the wrapper).
    q = jnp.dot(xq.astype(bf16), wq_ref[0], preferred_element_type=f32) + bq_ref[0]
    k = jnp.dot(xk, wk_ref[0], preferred_element_type=f32) + bk_ref[0]
    v = jnp.dot(xv, wv_ref[0], preferred_element_type=f32) + bv_ref[0]

    qh = q.reshape(Bt, S, d_K).astype(bf16)    # leading-dim split: no relayout
    kh = k.reshape(Bt, S, d_K).astype(bf16)
    vh = v.reshape(Bt, S, d_V).astype(bf16)

    # ---- scaled-dot-product scores + masked_fill (REPLACE, like torch).
    scores = jnp.einsum('bqd,bkd->bqk', qh, kh, preferred_element_type=f32)
    scores = jnp.where(mask_ref[...] != 0, f32(-1e9), scores)

    # ---- softmax over keys: bf16 exp (EUP), f32 row-sum, exact reciprocal.
    m = jnp.max(scores, axis=-1, keepdims=True)
    p16 = jnp.exp((scores - m).astype(bf16))                  # (Bt, S, S) bf16
    p32 = p16.astype(f32)
    denom = jnp.sum(p32, axis=-1, keepdims=True)
    recip = pl.reciprocal(denom)                              # exact: rows sum to 1

    # Returned attention == exactly the weights used for the context matmul.
    attn_ref[...] = (p32 * recip).reshape(Bt, 1, S, S)

    # ---- context; normalization deferred past the matmul ((S,d_V) vs (S,S) mul).
    ctx = jnp.einsum('bqk,bkd->bqd', p16, vh, preferred_element_type=f32) * recip

    # ---- this head's contribution to the output projection (head-major W_O).
    part = jnp.dot(ctx.reshape(Bt * S, d_V).astype(bf16), wo_ref[0],
                   preferred_element_type=f32)                # (Bt*S, D)

    @pl.when(h == 0)
    def _():
        acc_ref[...] = jnp.zeros_like(acc_ref)

    acc_ref[...] += part

    # ---- finalize once per batch block: bias + residual + LayerNorm (eps 1e-5).
    @pl.when(h == last_h)
    def _():
        y = acc_ref[...] + bo_ref[...] + xq
        mean = jnp.mean(y, axis=-1, keepdims=True)
        cen = y - mean
        var = jnp.mean(cen * cen, axis=-1, keepdims=True)
        normed = cen * jax.lax.rsqrt(var + f32(1e-5))
        out_ref[...] = (normed * gamma_ref[...] + beta_ref[...]).reshape(Bt, S, D)


def _default_vmem_limit_bytes():
    # v5e / v6e have 128 MiB physical VMEM -> be ambitious; v7x has 64 MiB per
    # TensorCore (and unknown generations) -> stay conservative.
    try:
        kind = jax.devices()[0].device_kind.lower()
    except Exception:
        kind = ""
    if "v5" in kind or "v6" in kind:
        return 96 * 1024 * 1024
    return 48 * 1024 * 1024


def _pick_block_b(B, S, D, d_K, d_V, budget_bytes):
    """Largest batch block whose per-step working set fits the VMEM budget.

    Counts double-buffered input/output blocks, the accumulator scratch and the
    in-kernel temporaries (scores + exp copies + Q/K/V + ctx + partial), and
    prefers (a) >= 2 batch grid steps so both v7x TensorCores get parallel work
    and (b) MXU-aligned M = block_b * S (multiple of 256, else 128)."""
    hd = 3 * d_K + d_V

    def step_bytes(bb):
        m = bb * S
        io = (m * D * 4 + 2 * m * D * 2      # x_q f32 + x_k/x_v bf16 blocks
              + bb * S * S * 1               # int8 mask block
              + m * D * 4                    # LayerNorm output block (f32)
              + bb * S * S * 4               # per-head attention output block
              + 2 * D * hd + 4 * hd + 12 * D)  # bf16 weight slices + biases/LN
        tmp = (bb * S * S * 10               # scores f32 + exp bf16 + exp f32
               + m * hd * 6                  # q/k/v f32 + bf16 copies
               + m * D * 6                   # output-projection partial (+cast)
               + m * d_V * 6)                # context
        acc = m * D * 4                      # VMEM scratch accumulator
        return 2 * io + acc + tmp            # ins/outs double-buffered

    divisors = [d for d in range(1, B + 1) if B % d == 0]
    fitting = [d for d in divisors if step_bytes(d) <= budget_bytes] or [1]

    def pref(d):
        m = d * S
        return (B // d >= 2, (m % 256 == 0) * 2 + (m % 128 == 0), d)

    return max(fitting, key=pref)


def multi_head_attention(x_q, x_k, x_v, mask, params, *, d_K, d_V, n_heads,
                         block_b=None, vmem_limit_bytes=None):
    B, S, D = x_q.shape
    assert D == n_heads * d_K
    wq, bq, wk, bk, wv, bv, wo, bo, gamma, beta = params
    f32, bf16 = jnp.float32, jnp.bfloat16
    H = n_heads
    scale = np.float32(1.0 / np.sqrt(d_K))

    # ---- one-time wrapper-side preprocessing ----
    # Head-major weights (so the kernel needs no transposes), 1/sqrt(d_K) folded
    # into W_Q/b_Q, MXU operands cast to bf16 once, mask shipped as int8.
    wq_h = (wq.astype(f32) * scale).reshape(D, H, d_K).transpose(1, 0, 2).astype(bf16)
    wk_h = wk.astype(f32).reshape(D, H, d_K).transpose(1, 0, 2).astype(bf16)
    wv_h = wv.astype(f32).reshape(D, H, d_V).transpose(1, 0, 2).astype(bf16)
    wo_h = wo.astype(f32).reshape(H, d_V, D).astype(bf16)
    bq_h = (bq.astype(f32) * scale).reshape(H, 1, d_K)
    bk_h = bk.astype(f32).reshape(H, 1, d_K)
    bv_h = bv.astype(f32).reshape(H, 1, d_V)
    bo2 = bo.astype(f32).reshape(1, D)
    gamma2 = gamma.astype(f32).reshape(1, D)
    beta2 = beta.astype(f32).reshape(1, D)
    mask_i8 = (mask != 0).astype(jnp.int8)
    xk16 = x_k.astype(bf16)
    xv16 = x_v.astype(bf16)

    if vmem_limit_bytes is None:
        vmem_limit_bytes = _default_vmem_limit_bytes()
    if block_b is None:
        block_b = _pick_block_b(B, S, D, d_K, d_V,
                                budget_bytes=int(0.75 * vmem_limit_bytes))
    assert B % block_b == 0
    grid = (B // block_b, H)

    b3 = lambda b, h: (b, 0, 0)            # batch-blocked, constant across heads
    h3 = lambda b, h: (h, 0, 0)            # per-head weight / bias slice
    c2 = lambda b, h: (0, 0)               # replicated (bias / LayerNorm params)

    in_specs = [
        pl.BlockSpec((block_b, S, D), b3),          # x_q (f32, residual)
        pl.BlockSpec((block_b, S, D), b3),          # x_k (bf16)
        pl.BlockSpec((block_b, S, D), b3),          # x_v (bf16)
        pl.BlockSpec((block_b, S, S), b3),          # mask (int8)
        pl.BlockSpec((1, D, d_K), h3),              # W_Q head slice (pre-scaled, bf16)
        pl.BlockSpec((1, 1, d_K), h3),              # b_Q head slice (pre-scaled)
        pl.BlockSpec((1, D, d_K), h3),              # W_K head slice
        pl.BlockSpec((1, 1, d_K), h3),              # b_K head slice
        pl.BlockSpec((1, D, d_V), h3),              # W_V head slice
        pl.BlockSpec((1, 1, d_V), h3),              # b_V head slice
        pl.BlockSpec((1, d_V, D), h3),              # W_O head slice
        pl.BlockSpec((1, D), c2),                   # b_O
        pl.BlockSpec((1, D), c2),                   # LN gamma
        pl.BlockSpec((1, D), c2),                   # LN beta
    ]
    out_specs = (
        pl.BlockSpec((block_b, S, D), b3),                      # output (resident over h)
        pl.BlockSpec((block_b, 1, S, S), lambda b, h: (b, h, 0, 0)),  # attention
    )
    out_shape = (
        jax.ShapeDtypeStruct((B, S, D), jnp.float32),
        jax.ShapeDtypeStruct((B, H, S, S), jnp.float32),
    )

    return pl.pallas_call(
        _mha_kernel,
        out_shape=out_shape,
        grid=grid,
        in_specs=in_specs,
        out_specs=out_specs,
        scratch_shapes=[pltpu.VMEM((block_b * S, D), jnp.float32)],
        compiler_params=pltpu.CompilerParams(
            dimension_semantics=("parallel", "arbitrary"),
            vmem_limit_bytes=vmem_limit_bytes),
    )(x_q, xk16, xv16, mask_i8, wq_h, bq_h, wk_h, bk_h, wv_h, bv_h,
      wo_h, bo2, gamma2, beta2)


def _reference(x_q, x_k, x_v, mask, params, *, d_K, d_V, n_heads):
    """Plain-JAX (float32) reference mirroring the PyTorch forward semantics."""
    wq, bq, wk, bk, wv, bv, wo, bo, gamma, beta = params
    B, S, d_model = x_q.shape

    Q = x_q @ wq + bq
    K = x_k @ wk + bk
    V = x_v @ wv + bv

    q_s = Q.reshape(B, S, n_heads, d_K).transpose(0, 2, 1, 3)
    k_s = K.reshape(B, S, n_heads, d_K).transpose(0, 2, 1, 3)
    v_s = V.reshape(B, S, n_heads, d_V).transpose(0, 2, 1, 3)

    scores = jnp.einsum("bhqd,bhkd->bhqk", q_s, k_s) / np.sqrt(d_K)
    scores = jnp.where(mask[:, None, :, :] != 0, -1e9, scores)
    attn = jax.nn.softmax(scores, axis=-1)
    ctx = jnp.einsum("bhqk,bhkd->bhqd", attn, v_s)
    ctx = ctx.transpose(0, 2, 1, 3).reshape(B, S, n_heads * d_V)

    out = ctx @ wo + bo + x_q
    mean = jnp.mean(out, axis=-1, keepdims=True)
    var = jnp.mean((out - mean) ** 2, axis=-1, keepdims=True)
    out = (out - mean) / jnp.sqrt(var + 1e-5) * gamma + beta
    return out, attn


if __name__ == "__main__":
    # Small config: d_model = n_heads * d_K (as asserted in the module).
    B, S = 2, 8
    n_heads, d_K, d_V = 4, 8, 8
    d_model = n_heads * d_K   # 32

    key = jax.random.PRNGKey(0)
    keys = jax.random.split(key, 12)

    x_q = jax.random.normal(keys[0], (B, S, d_model), jnp.float32)
    x_k = jax.random.normal(keys[1], (B, S, d_model), jnp.float32)
    x_v = jax.random.normal(keys[2], (B, S, d_model), jnp.float32)
    # Boolean mask (True => masked), like torch masked_fill_.
    mask = jax.random.uniform(keys[3], (B, S, S)) < 0.3

    def linear_params(kw, kb, fan_in, fan_out):
        bound = 1.0 / np.sqrt(fan_in)
        w = jax.random.uniform(kw, (fan_in, fan_out), jnp.float32, -bound, bound)
        b = jax.random.uniform(kb, (1, fan_out), jnp.float32, -bound, bound)
        return w, b

    wq, bq = linear_params(keys[4], keys[5], d_model, n_heads * d_K)
    wk, bk = linear_params(keys[6], keys[7], d_model, n_heads * d_K)
    wv, bv = linear_params(keys[8], keys[9], d_model, n_heads * d_V)
    wo, bo = linear_params(keys[10], keys[11], n_heads * d_V, d_model)
    gamma = jnp.ones((1, d_model), jnp.float32)    # LayerNorm default init
    beta = jnp.zeros((1, d_model), jnp.float32)

    params = (wq, bq, wk, bk, wv, bv, wo, bo, gamma, beta)

    out, attn = multi_head_attention(
        x_q, x_k, x_v, mask, params, d_K=d_K, d_V=d_V, n_heads=n_heads)
    jax.block_until_ready((out, attn))

    ref_out, ref_attn = _reference(
        x_q, x_k, x_v, mask, params, d_K=d_K, d_V=d_V, n_heads=n_heads)

    assert out.shape == (B, S, d_model)
    assert attn.shape == (B, n_heads, S, S)
    # Tolerance accounts for bf16 MXU operands / bf16 softmax exponent
    # (f32 accumulation and normalization) vs. the exact-f32 reference.
    np.testing.assert_allclose(np.asarray(out), np.asarray(ref_out),
                               rtol=5e-2, atol=5e-2)
    np.testing.assert_allclose(np.asarray(attn), np.asarray(ref_attn),
                               rtol=5e-2, atol=5e-2)
    print("KERNEL_OK")
</pallas_src>

<mosaic_0001>
module attributes {stable_mosaic.version = 11 : i64} {
  func.func @_mha_kernel(%arg0: i32, %arg1: i32, %arg2: memref<1x8x32xf32, #tpu.memory_space<vmem>>, %arg3: memref<1x8x32xbf16, #tpu.memory_space<vmem>>, %arg4: memref<1x8x32xbf16, #tpu.memory_space<vmem>>, %arg5: memref<1x8x8xi8, #tpu.memory_space<vmem>>, %arg6: memref<1x32x8xbf16, #tpu.memory_space<vmem>>, %arg7: memref<1x1x8xf32, #tpu.memory_space<vmem>>, %arg8: memref<1x32x8xbf16, #tpu.memory_space<vmem>>, %arg9: memref<1x1x8xf32, #tpu.memory_space<vmem>>, %arg10: memref<1x32x8xbf16, #tpu.memory_space<vmem>>, %arg11: memref<1x1x8xf32, #tpu.memory_space<vmem>>, %arg12: memref<1x8x32xbf16, #tpu.memory_space<vmem>>, %arg13: memref<1x32xf32, #tpu.memory_space<vmem>>, %arg14: memref<1x32xf32, #tpu.memory_space<vmem>>, %arg15: memref<1x32xf32, #tpu.memory_space<vmem>>, %arg16: memref<1x8x32xf32, #tpu.memory_space<vmem>>, %arg17: memref<1x1x8x8xf32, #tpu.memory_space<vmem>>, %arg18: memref<8x32xf32, #tpu.memory_space<vmem>>) attributes {dimension_semantics = [#tpu.dimension_semantics<parallel>, #tpu.dimension_semantics<arbitrary>], iteration_bounds = array<i64: 2, 4>, scalar_prefetch = 0 : i64, scratch_operands = 1 : i64, tpu.core_type = #tpu.core_type<tc>, window_params = [{transform_indices = @transform_0, window_bounds = array<i64: 1, 8, 32>}, {transform_indices = @transform_1, window_bounds = array<i64: 1, 8, 32>}, {transform_indices = @transform_2, window_bounds = array<i64: 1, 8, 32>}, {transform_indices = @transform_3, window_bounds = array<i64: 1, 8, 8>}, {transform_indices = @transform_4, window_bounds = array<i64: 1, 32, 8>}, {transform_indices = @transform_5, window_bounds = array<i64: 1, 1, 8>}, {transform_indices = @transform_6, window_bounds = array<i64: 1, 32, 8>}, {transform_indices = @transform_7, window_bounds = array<i64: 1, 1, 8>}, {transform_indices = @transform_8, window_bounds = array<i64: 1, 32, 8>}, {transform_indices = @transform_9, window_bounds = array<i64: 1, 1, 8>}, {transform_indices = @transform_10, window_bounds = array<i64: 1, 8, 32>}, {pipeline_mode = #tpu.pipeline_mode<synchronous>, transform_indices = @transform_11, window_bounds = array<i64: 1, 32>}, {pipeline_mode = #tpu.pipeline_mode<synchronous>, transform_indices = @transform_12, window_bounds = array<i64: 1, 32>}, {pipeline_mode = #tpu.pipeline_mode<synchronous>, transform_indices = @transform_13, window_bounds = array<i64: 1, 32>}, {transform_indices = @transform_14, window_bounds = array<i64: 1, 8, 32>}, {transform_indices = @transform_15, window_bounds = array<i64: 1, 1, 8, 8>}]} {
    %c0 = arith.constant 0 : index
    %c0_0 = arith.constant 0 : index
    %c0_1 = arith.constant 0 : index
    %0 = vector.load %arg2[%c0, %c0_0, %c0_1] : memref<1x8x32xf32, #tpu.memory_space<vmem>>, vector<1x8x32xf32>
    %1 = vector.shape_cast %0 : vector<1x8x32xf32> to vector<8x32xf32>
    %c0_2 = arith.constant 0 : index
    %c0_3 = arith.constant 0 : index
    %c0_4 = arith.constant 0 : index
    %2 = vector.load %arg3[%c0_2, %c0_3, %c0_4] : memref<1x8x32xbf16, #tpu.memory_space<vmem>>, vector<1x8x32xbf16>
    %3 = vector.shape_cast %2 : vector<1x8x32xbf16> to vector<8x32xbf16>
    %c0_5 = arith.constant 0 : index
    %c0_6 = arith.constant 0 : index
    %c0_7 = arith.constant 0 : index
    %4 = vector.load %arg4[%c0_5, %c0_6, %c0_7] : memref<1x8x32xbf16, #tpu.memory_space<vmem>>, vector<1x8x32xbf16>
    %5 = vector.shape_cast %4 : vector<1x8x32xbf16> to vector<8x32xbf16>
    %6 = arith.truncf %1 : vector<8x32xf32> to vector<8x32xbf16>
    %c0_8 = arith.constant 0 : index
    %c0_9 = arith.constant 0 : index
    %c0_10 = arith.constant 0 : index
    %7 = vector.load %arg6[%c0_8, %c0_9, %c0_10] : memref<1x32x8xbf16, #tpu.memory_space<vmem>>, vector<1x32x8xbf16>
    %8 = vector.shape_cast %7 : vector<1x32x8xbf16> to vector<32x8xbf16>
    %cst = arith.constant dense<0.000000e+00> : vector<8x8xf32>
    %9 = tpu.matmul %6, %8, %cst {dimension_numbers = #tpu.dot_dimension_numbers<[1], [0], [0], [1], [0, 0, 1, 1], [], []>} : vector<8x32xbf16>, vector<32x8xbf16>, vector<8x8xf32> -> vector<8x8xf32>
    %c0_11 = arith.constant 0 : index
    %c0_12 = arith.constant 0 : index
    %c0_13 = arith.constant 0 : index
    %10 = vector.load %arg7[%c0_11, %c0_12, %c0_13] : memref<1x1x8xf32, #tpu.memory_space<vmem>>, vector<1x1x8xf32>
    %11 = vector.shape_cast %10 : vector<1x1x8xf32> to vector<1x8xf32>
    %12 = vector.broadcast %11 : vector<1x8xf32> to vector<8x8xf32>
    %13 = arith.addf %9, %12 : vector<8x8xf32>
    %c0_14 = arith.constant 0 : index
    %c0_15 = arith.constant 0 : index
    %c0_16 = arith.constant 0 : index
    %14 = vector.load %arg8[%c0_14, %c0_15, %c0_16] : memref<1x32x8xbf16, #tpu.memory_space<vmem>>, vector<1x32x8xbf16>
    %15 = vector.shape_cast %14 : vector<1x32x8xbf16> to vector<32x8xbf16>
    %cst_17 = arith.constant dense<0.000000e+00> : vector<8x8xf32>
    %16 = tpu.matmul %3, %15, %cst_17 {dimension_numbers = #tpu.dot_dimension_numbers<[1], [0], [0], [1], [0, 0, 1, 1], [], []>} : vector<8x32xbf16>, vector<32x8xbf16>, vector<8x8xf32> -> vector<8x8xf32>
    %c0_18 = arith.constant 0 : index
    %c0_19 = arith.constant 0 : index
    %c0_20 = arith.constant 0 : index
    %17 = vector.load %arg9[%c0_18, %c0_19, %c0_20] : memref<1x1x8xf32, #tpu.memory_space<vmem>>, vector<1x1x8xf32>
    %18 = vector.shape_cast %17 : vector<1x1x8xf32> to vector<1x8xf32>
    %19 = vector.broadcast %18 : vector<1x8xf32> to vector<8x8xf32>
    %20 = arith.addf %16, %19 : vector<8x8xf32>
    %c0_21 = arith.constant 0 : index
    %c0_22 = arith.constant 0 : index
    %c0_23 = arith.constant 0 : index
    %21 = vector.load %arg10[%c0_21, %c0_22, %c0_23] : memref<1x32x8xbf16, #tpu.memory_space<vmem>>, vector<1x32x8xbf16>
    %22 = vector.shape_cast %21 : vector<1x32x8xbf16> to vector<32x8xbf16>
    %cst_24 = arith.constant dense<0.000000e+00> : vector<8x8xf32>
    %23 = tpu.matmul %5, %22, %cst_24 {dimension_numbers = #tpu.dot_dimension_numbers<[1], [0], [0], [1], [0, 0, 1, 1], [], []>} : vector<8x32xbf16>, vector<32x8xbf16>, vector<8x8xf32> -> vector<8x8xf32>
    %c0_25 = arith.constant 0 : index
    %c0_26 = arith.constant 0 : index
    %c0_27 = arith.constant 0 : index
    %24 = vector.load %arg11[%c0_25, %c0_26, %c0_27] : memref<1x1x8xf32, #tpu.memory_space<vmem>>, vector<1x1x8xf32>
    %25 = vector.shape_cast %24 : vector<1x1x8xf32> to vector<1x8xf32>
    %26 = vector.broadcast %25 : vector<1x8xf32> to vector<8x8xf32>
    %27 = arith.addf %23, %26 : vector<8x8xf32>
    %28 = vector.shape_cast %13 : vector<8x8xf32> to vector<1x8x8xf32>
    %29 = arith.truncf %28 : vector<1x8x8xf32> to vector<1x8x8xbf16>
    %30 = vector.shape_cast %20 : vector<8x8xf32> to vector<1x8x8xf32>
    %31 = arith.truncf %30 : vector<1x8x8xf32> to vector<1x8x8xbf16>
    %32 = vector.shape_cast %27 : vector<8x8xf32> to vector<1x8x8xf32>
    %33 = arith.truncf %32 : vector<1x8x8xf32> to vector<1x8x8xbf16>
    "tpu.trace_start"() <{level = 10 : i32, message = "bqd,bkd->bqk"}> : () -> ()
    %cst_28 = arith.constant dense<0.000000e+00> : vector<1x8x8xf32>
    %34 = tpu.matmul %29, %31, %cst_28 {dimension_numbers = #tpu.dot_dimension_numbers<[2], [2], [1], [1], [0, 0, 0, 1, 1, 1], [0], [0]>} : vector<1x8x8xbf16>, vector<1x8x8xbf16>, vector<1x8x8xf32> -> vector<1x8x8xf32>
    "tpu.trace_stop"() : () -> ()
    %c0_29 = arith.constant 0 : index
    %c0_30 = arith.constant 0 : index
    %c0_31 = arith.constant 0 : index
    %35 = vector.load %arg5[%c0_29, %c0_30, %c0_31] : memref<1x8x8xi8, #tpu.memory_space<vmem>>, vector<1x8x8xi8>
    %c0_i8 = arith.constant 0 : i8
    %36 = vector.broadcast %c0_i8 : i8 to vector<1x8x8xi8>
    %37 = arith.cmpi ne, %35, %36 : vector<1x8x8xi8>
    %cst_32 = arith.constant -1.000000e+09 : f32
    %38 = vector.broadcast %cst_32 : f32 to vector<1x8x8xf32>
    %39 = arith.select %37, %38, %34 : vector<1x8x8xi1>, vector<1x8x8xf32>
    %cst_33 = arith.constant dense<0xFF800000> : vector<1x8xf32>
    %40 = vector.multi_reduction <maximumf>, %39, %cst_33 [2] : vector<1x8x8xf32> to vector<1x8xf32>
    %41 = vector.shape_cast %40 : vector<1x8xf32> to vector<1x8x1xf32>
    %42 = vector.broadcast %41 : vector<1x8x1xf32> to vector<1x8x8xf32>
    %43 = arith.subf %39, %42 : vector<1x8x8xf32>
    %44 = arith.truncf %43 : vector<1x8x8xf32> to vector<1x8x8xbf16>
    %45 = math.exp %44 : vector<1x8x8xbf16>
    %46 = arith.extf %45 : vector<1x8x8xbf16> to vector<1x8x8xf32>
    %cst_34 = arith.constant dense<0.000000e+00> : vector<1x8xf32>
    %47 = vector.multi_reduction <add>, %46, %cst_34 [2] : vector<1x8x8xf32> to vector<1x8xf32>
    %48 = vector.shape_cast %47 : vector<1x8xf32> to vector<1x8x1xf32>
    %49 = tpu.reciprocal %48 : vector<1x8x1xf32> -> vector<1x8x1xf32>
    %50 = vector.broadcast %49 : vector<1x8x1xf32> to vector<1x8x8xf32>
    %51 = arith.mulf %46, %50 : vector<1x8x8xf32>
    %52 = vector.shape_cast %51 : vector<1x8x8xf32> to vector<1x1x8x8xf32>
    %c0_35 = arith.constant 0 : index
    %c0_36 = arith.constant 0 : index
    %c0_37 = arith.constant 0 : index
    %c0_38 = arith.constant 0 : index
    %53 = vector.load %arg17[%c0_35, %c0_36, %c0_37, %c0_38] : memref<1x1x8x8xf32, #tpu.memory_space<vmem>>, vector<1x1x8x8xf32>
    tpu.vector_store %arg17[%c0_35, %c0_36, %c0_37, %c0_38], %52 {strides = array<i32>} : memref<1x1x8x8xf32, #tpu.memory_space<vmem>>, vector<1x1x8x8xf32>,
    "tpu.trace_start"() <{level = 10 : i32, message = "bqk,bkd->bqd"}> : () -> ()
    %cst_39 = arith.constant dense<0.000000e+00> : vector<1x8x8xf32>
    %54 = tpu.matmul %45, %33, %cst_39 {dimension_numbers = #tpu.dot_dimension_numbers<[2], [1], [1], [2], [0, 0, 0, 1, 1, 2], [0], [0]>} : vector<1x8x8xbf16>, vector<1x8x8xbf16>, vector<1x8x8xf32> -> vector<1x8x8xf32>
    "tpu.trace_stop"() : () -> ()
    %55 = vector.broadcast %49 : vector<1x8x1xf32> to vector<1x8x8xf32>
    %56 = arith.mulf %54, %55 : vector<1x8x8xf32>
    %57 = vector.shape_cast %56 : vector<1x8x8xf32> to vector<8x8xf32>
    %58 = arith.truncf %57 : vector<8x8xf32> to vector<8x8xbf16>
    %c0_40 = arith.constant 0 : index
    %c0_41 = arith.constant 0 : index
    %c0_42 = arith.constant 0 : index
    %59 = vector.load %arg12[%c0_40, %c0_41, %c0_42] : memref<1x8x32xbf16, #tpu.memory_space<vmem>>, vector<1x8x32xbf16>
    %60 = vector.shape_cast %59 : vector<1x8x32xbf16> to vector<8x32xbf16>
    %cst_43 = arith.constant dense<0.000000e+00> : vector<8x32xf32>
    %61 = tpu.matmul %58, %60, %cst_43 {dimension_numbers = #tpu.dot_dimension_numbers<[1], [0], [0], [1], [0, 0, 1, 1], [], []>} : vector<8x8xbf16>, vector<8x32xbf16>, vector<8x32xf32> -> vector<8x32xf32>
    %c0_i32 = arith.constant 0 : i32
    %62 = arith.cmpi eq, %arg1, %c0_i32 : i32
    %63 = arith.extui %62 : i1 to i32
    %c0_i32_44 = arith.constant 0 : i32
    %64 = arith.cmpi ne, %63, %c0_i32_44 : i32
    scf.if %64 {
      %cst_50 = arith.constant 0.000000e+00 : f32
      %71 = vector.broadcast %cst_50 : f32 to vector<8x32xf32>
      %c0_51 = arith.constant 0 : index
      %c0_52 = arith.constant 0 : index
      %72 = vector.load %arg18[%c0_51, %c0_52] : memref<8x32xf32, #tpu.memory_space<vmem>>, vector<8x32xf32>
      tpu.vector_store %arg18[%c0_51, %c0_52], %71 {strides = array<i32>} : memref<8x32xf32, #tpu.memory_space<vmem>>, vector<8x32xf32>,
    } else {
    }
    %c0_45 = arith.constant 0 : index
    %c0_46 = arith.constant 0 : index
    %65 = vector.load %arg18[%c0_45, %c0_46] : memref<8x32xf32, #tpu.memory_space<vmem>>, vector<8x32xf32>
    %66 = arith.addf %65, %61 : vector<8x32xf32>
    %c0_47 = arith.constant 0 : index
    %c0_48 = arith.constant 0 : index
    %67 = vector.load %arg18[%c0_47, %c0_48] : memref<8x32xf32, #tpu.memory_space<vmem>>, vector<8x32xf32>
    tpu.vector_store %arg18[%c0_47, %c0_48], %66 {strides = array<i32>} : memref<8x32xf32, #tpu.memory_space<vmem>>, vector<8x32xf32>,
    %c3_i32 = arith.constant 3 : i32
    %68 = arith.cmpi eq, %arg1, %c3_i32 : i32
    %69 = arith.extui %68 : i1 to i32
    %c0_i32_49 = arith.constant 0 : i32
    %70 = arith.cmpi ne, %69, %c0_i32_49 : i32
    scf.if %70 {
      %c0_50 = arith.constant 0 : index
      %c0_51 = arith.constant 0 : index
      %71 = vector.load %arg18[%c0_50, %c0_51] : memref<8x32xf32, #tpu.memory_space<vmem>>, vector<8x32xf32>
      %c0_52 = arith.constant 0 : index
      %c0_53 = arith.constant 0 : index
      %72 = vector.load %arg13[%c0_52, %c0_53] : memref<1x32xf32, #tpu.memory_space<vmem>>, vector<1x32xf32>
      %73 = vector.broadcast %72 : vector<1x32xf32> to vector<8x32xf32>
      %74 = arith.addf %71, %73 : vector<8x32xf32>
      %75 = arith.addf %74, %1 : vector<8x32xf32>
      %cst_54 = arith.constant dense<0.000000e+00> : vector<8xf32>
      %76 = vector.multi_reduction <add>, %75, %cst_54 [1] : vector<8x32xf32> to vector<8xf32>
      %77 = vector.shape_cast %76 : vector<8xf32> to vector<8x1xf32>
      %cst_55 = arith.constant 3.200000e+01 : f32
      %78 = vector.broadcast %cst_55 : f32 to vector<8x1xf32>
      %79 = arith.divf %77, %78 : vector<8x1xf32>
      %80 = vector.broadcast %79 : vector<8x1xf32> to vector<8x32xf32>
      %81 = arith.subf %75, %80 : vector<8x32xf32>
      %82 = arith.mulf %81, %81 : vector<8x32xf32>
      %cst_56 = arith.constant dense<0.000000e+00> : vector<8xf32>
      %83 = vector.multi_reduction <add>, %82, %cst_56 [1] : vector<8x32xf32> to vector<8xf32>
      %84 = vector.shape_cast %83 : vector<8xf32> to vector<8x1xf32>
      %cst_57 = arith.constant 3.200000e+01 : f32
      %85 = vector.broadcast %cst_57 : f32 to vector<8x1xf32>
      %86 = arith.divf %84, %85 : vector<8x1xf32>
      %cst_58 = arith.constant 9.99999974E-6 : f32
      %87 = vector.broadcast %cst_58 : f32 to vector<8x1xf32>
      %88 = arith.addf %86, %87 : vector<8x1xf32>
      %89 = math.rsqrt %88 : vector<8x1xf32>
      %90 = vector.broadcast %89 : vector<8x1xf32> to vector<8x32xf32>
      %91 = arith.mulf %81, %90 : vector<8x32xf32>
      %c0_59 = arith.constant 0 : index
      %c0_60 = arith.constant 0 : index
      %92 = vector.load %arg14[%c0_59, %c0_60] : memref<1x32xf32, #tpu.memory_space<vmem>>, vector<1x32xf32>
      %93 = vector.broadcast %92 : vector<1x32xf32> to vector<8x32xf32>
      %94 = arith.mulf %91, %93 : vector<8x32xf32>
      %c0_61 = arith.constant 0 : index
      %c0_62 = arith.constant 0 : index
      %95 = vector.load %arg15[%c0_61, %c0_62] : memref<1x32xf32, #tpu.memory_space<vmem>>, vector<1x32xf32>
      %96 = vector.broadcast %95 : vector<1x32xf32> to vector<8x32xf32>
      %97 = arith.addf %94, %96 : vector<8x32xf32>
      %98 = vector.shape_cast %97 : vector<8x32xf32> to vector<1x8x32xf32>
      %c0_63 = arith.constant 0 : index
      %c0_64 = arith.constant 0 : index
      %c0_65 = arith.constant 0 : index
      %99 = vector.load %arg16[%c0_63, %c0_64, %c0_65] : memref<1x8x32xf32, #tpu.memory_space<vmem>>, vector<1x8x32xf32>
      tpu.vector_store %arg16[%c0_63, %c0_64, %c0_65], %98 {strides = array<i32>} : memref<1x8x32xf32, #tpu.memory_space<vmem>>, vector<1x8x32xf32>,
    } else {
    }
    return
  }
  func.func @transform_0(%arg0: i32, %arg1: i32) -> (i32, i32, i32) {
    %c0_i32 = arith.constant 0 : i32
    %c0_i32_0 = arith.constant 0 : i32
    %c0_i32_1 = arith.constant 0 : i32
    return %arg0, %c0_i32, %c0_i32_0 : i32, i32, i32
  }
  func.func @transform_1(%arg0: i32, %arg1: i32) -> (i32, i32, i32) {
    %c0_i32 = arith.constant 0 : i32
    %c0_i32_0 = arith.constant 0 : i32
    %c0_i32_1 = arith.constant 0 : i32
    return %arg0, %c0_i32, %c0_i32_0 : i32, i32, i32
  }
  func.func @transform_2(%arg0: i32, %arg1: i32) -> (i32, i32, i32) {
    %c0_i32 = arith.constant 0 : i32
    %c0_i32_0 = arith.constant 0 : i32
    %c0_i32_1 = arith.constant 0 : i32
    return %arg0, %c0_i32, %c0_i32_0 : i32, i32, i32
  }
  func.func @transform_3(%arg0: i32, %arg1: i32) -> (i32, i32, i32) {
    %c0_i32 = arith.constant 0 : i32
    %c0_i32_0 = arith.constant 0 : i32
    %c0_i32_1 = arith.constant 0 : i32
    return %arg0, %c0_i32, %c0_i32_0 : i32, i32, i32
  }
  func.func @transform_4(%arg0: i32, %arg1: i32) -> (i32, i32, i32) {
    %c0_i32 = arith.constant 0 : i32
    %c0_i32_0 = arith.constant 0 : i32
    %c0_i32_1 = arith.constant 0 : i32
    return %arg1, %c0_i32, %c0_i32_0 : i32, i32, i32
  }
  func.func @transform_5(%arg0: i32, %arg1: i32) -> (i32, i32, i32) {
    %c0_i32 = arith.constant 0 : i32
    %c0_i32_0 = arith.constant 0 : i32
    %c0_i32_1 = arith.constant 0 : i32
    return %arg1, %c0_i32, %c0_i32_0 : i32, i32, i32
  }
  func.func @transform_6(%arg0: i32, %arg1: i32) -> (i32, i32, i32) {
    %c0_i32 = arith.constant 0 : i32
    %c0_i32_0 = arith.constant 0 : i32
    %c0_i32_1 = arith.constant 0 : i32
    return %arg1, %c0_i32, %c0_i32_0 : i32, i32, i32
  }
  func.func @transform_7(%arg0: i32, %arg1: i32) -> (i32, i32, i32) {
    %c0_i32 = arith.constant 0 : i32
    %c0_i32_0 = arith.constant 0 : i32
    %c0_i32_1 = arith.constant 0 : i32
    return %arg1, %c0_i32, %c0_i32_0 : i32, i32, i32
  }
  func.func @transform_8(%arg0: i32, %arg1: i32) -> (i32, i32, i32) {
    %c0_i32 = arith.constant 0 : i32
    %c0_i32_0 = arith.constant 0 : i32
    %c0_i32_1 = arith.constant 0 : i32
    return %arg1, %c0_i32, %c0_i32_0 : i32, i32, i32
  }
  func.func @transform_9(%arg0: i32, %arg1: i32) -> (i32, i32, i32) {
    %c0_i32 = arith.constant 0 : i32
    %c0_i32_0 = arith.constant 0 : i32
    %c0_i32_1 = arith.constant 0 : i32
    return %arg1, %c0_i32, %c0_i32_0 : i32, i32, i32
  }
  func.func @transform_10(%arg0: i32, %arg1: i32) -> (i32, i32, i32) {
    %c0_i32 = arith.constant 0 : i32
    %c0_i32_0 = arith.constant 0 : i32
    %c0_i32_1 = arith.constant 0 : i32
    return %arg1, %c0_i32, %c0_i32_0 : i32, i32, i32
  }
  func.func @transform_11(%arg0: i32, %arg1: i32) -> (i32, i32) {
    %c0_i32 = arith.constant 0 : i32
    %c0_i32_0 = arith.constant 0 : i32
    %c0_i32_1 = arith.constant 0 : i32
    return %c0_i32, %c0_i32_0 : i32, i32
  }
  func.func @transform_12(%arg0: i32, %arg1: i32) -> (i32, i32) {
    %c0_i32 = arith.constant 0 : i32
    %c0_i32_0 = arith.constant 0 : i32
    %c0_i32_1 = arith.constant 0 : i32
    return %c0_i32, %c0_i32_0 : i32, i32
  }
  func.func @transform_13(%arg0: i32, %arg1: i32) -> (i32, i32) {
    %c0_i32 = arith.constant 0 : i32
    %c0_i32_0 = arith.constant 0 : i32
    %c0_i32_1 = arith.constant 0 : i32
    return %c0_i32, %c0_i32_0 : i32, i32
  }
  func.func @transform_14(%arg0: i32, %arg1: i32) -> (i32, i32, i32) {
    %c0_i32 = arith.constant 0 : i32
    %c0_i32_0 = arith.constant 0 : i32
    %c0_i32_1 = arith.constant 0 : i32
    return %arg0, %c0_i32, %c0_i32_0 : i32, i32, i32
  }
  func.func @transform_15(%arg0: i32, %arg1: i32) -> (i32, i32, i32, i32) {
    %c0_i32 = arith.constant 0 : i32
    %c0_i32_0 = arith.constant 0 : i32
    %c0_i32_1 = arith.constant 0 : i32
    return %arg0, %arg1, %c0_i32, %c0_i32_0 : i32, i32, i32, i32
  }
}

</mosaic_0001>

<bundles_post_ra>
// kernel: tpu_custom_call.1
= control target key start
LH: loop header
LB: loop body
LE: loop exit
PB: predicated region body
PF: predicated region fallthrough
CT: control target
= control target key end

     0   :  { %s2150_s0 = inlined_call_operand.vmem [shape: f32[2,8,32], index: 0, kind: input, shape index: {}]   ;;  %s2151_s1 = inlined_call_operand.vmem [shape: bf16[2,8,32], index: 1, kind: input, shape index: {}]   ;;  %s2152_s2 = inlined_call_operand.vmem [shape: bf16[2,8,32], index: 2, kind: input, shape index: {}]   ;;  %s2153_s3 = inlined_call_operand.vmem [shape: s8[2,8,8], index: 3, kind: input, shape index: {}]   ;;  %s2154_s4 = inlined_call_operand.vmem [shape: bf16[4,32,8], index: 4, kind: input, shape index: {}]   ;;  %s2155_s5 = inlined_call_operand.vmem [shape: f32[4,1,8], index: 5, kind: input, shape index: {}]   ;;  %s2156_s6 = inlined_call_operand.vmem [shape: bf16[4,32,8], index: 6, kind: input, shape index: {}]   ;;  %s2157_s7 = inlined_call_operand.vmem [shape: f32[4,1,8], index: 7, kind: input, shape index: {}]   ;;  %s2158_s8 = inlined_call_operand.vmem [shape: bf16[4,32,8], index: 8, kind: input, shape index: {}]   ;;  %s2159_s9 = inlined_call_operand.vmem [shape: f32[4,1,8], index: 9, kind: input, shape index: {}]   ;;  %s2160_s10 = inlined_call_operand.vmem [shape: bf16[4,8,32], index: 10, kind: input, shape index: {}]   ;;  %s2161_s11 = inlined_call_operand.vmem [shape: f32[1,32], index: 11, kind: input, shape index: {}]   ;;  %s2162_s12 = inlined_call_operand.vmem [shape: f32[1,32], index: 12, kind: input, shape index: {}]   ;;  %s2163_s13 = inlined_call_operand.vmem [shape: f32[1,32], index: 13, kind: input, shape index: {}]   ;;  %s2164_s14 = inlined_call_operand.hbm [shape: f32[2,8,32], index: 14, kind: output, shape index: {0}]   ;;  %s2165_s15 = inlined_call_operand.hbm [shape: f32[2,4,8,8], index: 15, kind: output, shape index: {1}]  }
   0x1   :  { %2180 = sst [smem:[#allocation19_spill]] %s2150_s0 }
   0x2   :  { %2181 = sst [smem:[#allocation20_spill]] %s2151_s1 }
   0x3   :  { %2182 = sst [smem:[#allocation21_spill]] %s2152_s2 }
   0x4   :  { %2183 = sst [smem:[#allocation22_spill]] %s2154_s4 }
   0x5   :  { %2184 = sst [smem:[#allocation23_spill]] %s2156_s6 }
   0x6   :  { %2185 = sst [smem:[#allocation24_spill]] %s2159_s9 }
   0x7   :  { %2186 = sst [smem:[#allocation25_spill]] %s2160_s10 }
   0x8   :  { %2187 = sst [smem:[#allocation26_spill]] %s2161_s11 }
   0x9   :  { %2188 = sst [smem:[#allocation27_spill]] %s2162_s12 }
   0xa   :  { %2189 = sst [smem:[#allocation28_spill]] %s2163_s13 }
   0xb   :  { %2190 = sst [smem:[#allocation29_spill]] %s2164_s14 }
   0xc   :  { %2191 = sst [smem:[#allocation30_spill]] %s2165_s15 }
   0xd   :  { %21 = vsyncpa [#allocation4], 0 }
   0xe   :  { %23 = vsyncpa [#allocation4 + $0x1], 0 }
   0xf   :  { %24 = vsyncpa [#allocation6], 0 }
  0x10   :  { %26 = vsyncpa [#allocation6 + $0x1], 0  ;;  %s1819_s18 = smov 0   ;;  %s1821_s19 = smov 0  }
  0x11   :  { %s1823_s20 = smov 0   ;;  %s1825_s21 = smov 0  }
  0x12   :  { %s1827_s22 = smov 0   ;;  %s1829_s23 = smov 0  }
  0x13   :  { %s1831_s24 = smov 0   ;;  %s1833_s25 = smov 0  }
  0x14   :  { %s1835_s26 = smov 0   ;;  %s1837_s27 = smov 0  }
  0x15   :  { %s1839_s28 = smov 0  }
  0x16 LB: > { %2192 = sst [smem:[#allocation9_spill]] %s1699_s20  ;;  %s1360_s29 = sadd.s32 4294967295, %s1731_s28   ;;  %s1731_s28 = sphi %s1839_s28, %s32_s28   ;;  %s1727_s27 = sphi %s1837_s27, %s2235_s27   ;;  %s1723_s26 = sphi %s1835_s26, %s2234_s26   ;;  %s1719_s25 = sphi %s1833_s25, %s2233_s25   ;;  %s1715_s24 = sphi %s1831_s24, %s2232_s24   ;;  %s1711_s23 = sphi %s1829_s23, %s2231_s23   ;;  %s1707_s22 = sphi %s1827_s22, %s2239_s22   ;;  %s1703_s21 = sphi %s1825_s21, %s2238_s21   ;;  %s1699_s20 = sphi %s1823_s20, %s2229_s20   ;;  %s1695_s19 = sphi %s1821_s19, %s2237_s19   ;;  %s1691_s18 = sphi %s1819_s18, %s2236_s18  }
  0x17   : > { %2193 = sst [smem:[#allocation10_spill]] %s1703_s21  ;;  %s1361_s30 = sadd.s32 4294967294, %s1731_s28  }
  0x18   : > { %2194 = sst [smem:[#allocation11_spill]] %s1711_s23  ;;  %s41_s16 = sadd.s32 1, %s1723_s26 }
  0x19   : > { %2195 = sst [smem:[#allocation12_spill]] %s1723_s26  ;;  %s44_s17 = sadd.s32 1, %s1727_s27 }
  0x1a   : > { %2196 = sst [smem:[#allocation13_spill]] %s1727_s27  ;;  %p42_p0 = scmp.ge.s32.totalorder %s41_s16, 4 }
  0x1b   : > { %s400_s15 = sadd.s32 1, %s1711_s23  ;;  %p410_p1 = scmp.ne.s32.totalorder %s1711_s23, %s1707_s22 }
  0x1c   : > { %p1881_p2 = scmp.eq.s32.totalorder %s1360_s29, 7  ;;  %s2241_s16 = smov (%p42_p0, %s41_s16), 0 }
  0x1d   : > { %2198 = sst [smem:[#allocation14_spill]] %s2241_s16  ;;  %s2243_s17 = smov (!%p42_p0, %s44_s17), %s1727_s27 }
  0x1e   : > { %p1890_p3 = por %p1881_p2, %p410_p1  ;;  %p416_p4 = scmp.ne.s32.totalorder %s1707_s22, %s1703_s21 }
  0x1f   : > { %p46_p5 = scmp.ge.s32.totalorder %s2243_s17, 2  ;;  %p1896_p6 = scmp.eq.s32.totalorder %s1361_s30, 7 }
  0x20   : > { %s2199_s13 = scalar_select %p1890_p3, 1, 0 }
  0x21   : > { %s424_s12 = ssub.s32 %s1723_s26, %s2241_s16  ;;  %s428_s11 = sadd.s32 1, %s1699_s20 }
  0x22   : > { %2200 = sst [smem:[#allocation15_spill]] %s2199_s13  ;;  %s2245_s17 = smov (%p46_p5, %s2243_s17), 0 }
  0x23   : > { %2202 = sst [smem:[#allocation16_spill]] %s2245_s17  ;;  %p1907_p7 = por %p1896_p6, %p416_p4 }
  0x24   : > { %p438_p8 = scmp.ne.s32.totalorder %s1699_s20, %s1695_s19  ;;  %s397_s21 = ssub.s32 %s1727_s27, %s2245_s17 }
  0x25   : > { %p444_p9 = scmp.ne.s32.totalorder %s1695_s19, %s1691_s18  ;;  %p398_p10 = scmp.eq.s32.totalorder %s397_s21, 0 }
  0x26   : > { %s425_s30 = sor.u32 %s424_s12, %s397_s21  ;;  %p1919_p12 = por %p438_p8, %p1881_p2 }
  0x27   : > { %p426_p11 = scmp.eq.s32.totalorder %s425_s30, 0  ;;  %p1931_p13 = por %p444_p9, %p1896_p6 }
  0x28   : > { %s1924_s16 = scalar_select %p398_p10, %s1711_s23, %s400_s15  }
  0x29   : > { %s1927_s26 = scalar_select %p426_p11, %s1699_s20, %s428_s11  }
  0x2a   : > { %2205 = sst [smem:[#allocation17_spill]] %s1924_s16  ;;  %p1364_p0 = scmp.ge.s32.totalorder %s1731_s28, 1 }
  0x2b   : > { %2206 = sst [smem:[#allocation18_spill]] %s1927_s26  ;;  %p549_p1 = scmp.lt.s32.totalorder %s1731_s28, 9 }
  0x2c   : > { %s2207_s9 = scalar_select %p1931_p13, 1, 0 }
  0x2d   : > { %p550_p4 = pnand %p1364_p0, %p549_p1 }
  0x2e   : > { %p657_p2 = scmp.lt.s32.totalorder (!%p550_p4), %s1715_s24, 3  ;;  %s2173_s12 = sand.u32 (!%p550_p4), 1, %s1707_s22   ;;  %v1733_v0 = vmov (!%p550_p4), 0.0   ;;  %vm1734_vm0 = vmmov (!%p550_p4), 0   ;;  %vm715_vm1 = vcmask (!%p550_p4), 261120   ;;  %vm894_vm2 = vcmask (!%p550_p4), 64512  }
  0x2f   : > { %553 = sbr.rel (%p550_p4) target bundleno = 1479 (0x5c7), region = 76  ;;  %1431 = vmatprep.subr.bf16.mxu1 (!%p550_p4), %v1733_v0  ;;  %s1942_s11 = sshll.u32 (!%p550_p4), %s2173_s12, 3  ;;  %1423 = vmatprep.subr.bf16.mxu0 (!%p550_p4), %v1733_v0  ;;  %v1735_v27 = vmov (!%p550_p4), 0   ;;  %vm965_vm5 = vcmask (!%p550_p4), 1043456  }
  0x30   : > { %1435 = vmatprep.mubr.msk.bf16.mxu1 (!%p550_p4), %vm1734_vm0, %v1733_v0  ;;  %1427 = vmatprep.mubr.msk.bf16.mxu0 (!%p550_p4), %vm1734_vm0, %v1733_v0  ;;  %p641_p5 = scmp.lt.s32.totalorder (!%p550_p4), %s1719_s25, 1  ;;  %s2208_s6 = sld [smem:[#allocation23_spill]] (!%p550_p4) }
  0x31   : > { %s2209_s4 = sld [smem:[#allocation22_spill]] (!%p550_p4)  ;;  %s2210_s1 = sld [smem:[#allocation20_spill]] (!%p550_p4) }
  0x32   : > { %s2211_s0 = sld [smem:[#allocation19_spill]] (!%p550_p4)  ;;  %s2212_s2 = sld [smem:[#allocation21_spill]] (!%p550_p4) }
  0x33   : > { %p1393_p6 = scmp.ne.s32.totalorder (!%p550_p4), %s1715_s24, 0 }
  0x36   : > { %s1946_s14 = scalar_select %p657_p2, %s1715_s24, 3 }
  0x37   : > { %s1961_s16 = scalar_select %p641_p5, %s1719_s25, 1 }
  0x38   : > { %s1405_s15 = sshll.u32 %s1946_s14, 4  ;;  %s672_s29 = scalar_lea.vmem %s2157_s7, %s1946_s14 }
  0x39   : > { %s669_s30 = scalar_lea.vmem %s2208_s6, %s1405_s15  ;;  %s661_s27 = scalar_lea.vmem %s2209_s4, %s1405_s15  ;;  %v1382_v11 = vld [vmem:[%s672_s29] ss:$0 sm:$0xff] }
  0x3a   : > { %v1569_v1 = vld [vmem:[%s669_s30] sm:$0xff]   ;;  %v1570_v2 = vld [vmem:[%s669_s30 + $0x8] sm:$0xff]   ;;  %s677_s20 = scalar_lea.vmem %s2158_s8, %s1405_s15  ;;  %s1368_s21 = sshll.u32 %s1961_s16, 2 }
  0x3b   : > { %1432 = vmatpush3.bf16.msra.mxu1 %v1569_v1  ;;  %v1571_v3 = vld [vmem:[%s661_s27] sm:$0xff]   ;;  %v1572_v4 = vld [vmem:[%s661_s27 + $0x8] sm:$0xff]   ;;  %s648_s17 = scalar_lea.vmem %s2210_s1, %s1368_s21  ;;  %s1367_s12 = sshll.u32 %s1961_s16, 3 }
  0x3c   : > { %1433 = vmatprep.subr.bf16.mxu1 %v1733_v0  ;;  %1424 = vmatpush3.bf16.msra.mxu0 %v1571_v3  ;;  %v689_v5 = vld [vmem:[%s648_s17] sm:$0xf]  ;;  %s644_s23 = scalar_lea.vmem %s2211_s0, %s1367_s12  ;;  %v1574_v9 = vld [vmem:[%s677_s20 + $0x8] sm:$0xff]   ;;  %s652_s26 = scalar_lea.vmem %s2212_s2, %s1368_s21 }
  0x3d   : > { %1425 = vmatprep.subr.bf16.mxu0 %v1733_v0  ;;  %v1976_v6 = vld [vmem:[%s644_s23] sm:$0xff]  ;;  %s664_s21 = scalar_lea.vmem %s2155_s5, %s1946_s14  ;;  %s1370_s12 = sshll.u32 %s1961_s16, 1 }
  0x3e   : > { %v691_v7 = vpack.c.bf16 %v1976_v6, %v1976_v6  ;;  %v1573_v8 = vld [vmem:[%s677_s20] sm:$0xff]   ;;  %s656_s4 = scalar_lea.vmem %s2153_s3, %s1370_s12  ;;  %s1377_s15 = sshll.u32 %s1946_s14, 2 }
  0x3f   : > { %1434 = vmatpush3.bf16.msra.mxu1 %v1570_v2  ;;  %v690_v10 = vld [vmem:[%s652_s26] sm:$0xf]  ;;  %s2213_s26 = sld [smem:[#allocation24_spill]]  ;;  %s2214_s17 = sld [smem:[#allocation25_spill]]  ;;  %v1736_v2 = vmov (!%p1393_p6), 0.0  }
  0x40   : > { %1447 = vmatprep.subr.bf16.mxu1 %v1733_v0  ;;  %1426 = vmatpush3.bf16.msra.mxu0 %v1572_v4  ;;  %v1378_v16 = vld [vmem:[%s664_s21] ss:$0 sm:$0xff]  ;;  %s2178_s12 = sand.u32 1, %s1695_s19   ;;  %s633_s23 = scalar_lea.vmem [#allocation3], %s1942_s11  ;;  %1062 = vst.msk [vmem:[#allocation2] sm:$0xff] (!%p1393_p6), %vm715_vm1, %v1736_v2 }
  0x41   : > { %1439 = vmatprep.subr.bf16.mxu0 %v1733_v0  ;;  %v941_v26 = vld [vmem:[%s656_s4] sm:$0x3]  ;;  %s2029_s30 = sshll.u32 %s2178_s12, 3 }
  0x42   : > { %1436 = vmatmul.mubr.msk.bf16.vlgmr.msra.gmra.mrb[0].mxu1 %vm715_vm1, %v689_v5  ;;  %vm942_vm3 = vnez %v941_v26 }
  0x43   : > { %1449 = vmatprep.mubr.msk.bf16.mxu1 %vm1734_vm0, %v1733_v0  ;;  %1428 = vmatmul.mubr.msk.bf16.vlgmr.msra.gmra.mrb[0].mxu0 %vm715_vm1, %v691_v7  ;;  %v943_v28 = vsel %vm942_vm3, 16843009, %v1735_v27 }
  0x44   : > { %1443 = vmatprep.mubr.msk.bf16.mxu0 %vm1734_vm0, %v1733_v0  ;;  %1440 = vmatpush3.bf16.msra.mxu0 %v1573_v8  ;;  %v944_v29 = vunpack.c.0.s8 %v943_v28 }
  0x45   : > { %1441 = vmatprep.subr.bf16.mxu0 %v1733_v0  ;;  %s680_s27 = scalar_lea.vmem %s2213_s26, %s1946_s14  ;;  %s684_s21 = scalar_lea.vmem %s2214_s17, %s1377_s15 }
  0x46   : > { %vm945_vm4 = vcmp.ne.s32.totalorder %v944_v29, 0  ;;  %v1386_v37 = vld [vmem:[%s680_s27] ss:$0 sm:$0xff]  ;;  %s2179_s14 = scalar_lea.vmem [#allocation5], %s2029_s30 }
  0x47   : > { %v1011_v51 = vld [vmem:[%s684_s21] sm:$0xf] }
  0x48   : > { %1442 = vmatpush3.bf16.msra.mxu0 %v1574_v9  ;;  %v1016_v52 = vsel %vm965_vm5, %v1011_v51, 0 }
  0x49   : > { %1453 = vmatprep.subr.bf16.mxu0 %v1733_v0 }
  0x4b   : > { %1444 = vmatmul.mubr.msk.bf16.vlgmr.msra.gmra.mrb[4].mxu0 %vm715_vm1, %v690_v10 }
  0x4c   : > { %1455 = vmatprep.mubr.msk.bf16.mxu0 %vm1734_vm0, %v1733_v0 }
 0x115   : > { %v819_v12 = vpop.f32.mrb[0].mxu1 }
 0x116   : > { %v820_v13 = vadd.f32 %v1382_v11, %v819_v12  ;;  %v1437_v14 = vpop.f32.mrb[1].mxu1  ;;  %v753_v17 = vpop.f32.mrb[0].mxu0 }
 0x117   : > { %v822_v15 = vpop.f32.mrb[2].mxu1  ;;  %v1429_v20 = vpop.f32.mrb[1].mxu0  ;;  %v754_v23 = vadd.f32 %v1378_v16, %v753_v17 }
 0x118   : > { %v892_v18 = vpack.c.bf16 %v820_v13, %v820_v13  ;;  %v1438_v19 = vpop.f32.mrb[3].mxu1  ;;  %v756_v21 = vpop.f32.mrb[2].mxu0 }
 0x119   : > { %v1430_v24 = vpop.f32.mrb[3].mxu0  ;;  %v891_v25 = vpack.c.bf16 %v754_v23, %v754_v23 }
 0x11a   : > { %v899_v22 = vsel %vm894_vm2, %v892_v18, 0 }
 0x11b   : > { %1448 = vmatpush3.bf16.xpose.msra.mxu1 %v899_v22 }
 0x11c   : > { %1459 = vmatprep.subr.bf16.mxu1 %v1733_v0 }
 0x11e   : > { %v885_v36 = vpop.f32.mrb[4].mxu0 }
 0x11f   : > { %v1445_v38 = vpop.f32.mrb[5].mxu0  ;;  %v886_v39 = vadd.f32 %v1386_v37, %v885_v36 }
 0x120   : > { %v888_v40 = vpop.f32.mrb[6].mxu0 }
 0x121   : > { %v1446_v41 = vpop.f32.mrb[7].mxu0  ;;  %v893_v42 = vpack.c.bf16 %v886_v39, %v886_v39 }
 0x122   : > { %1450 = vmatmul.mubr.msk.bf16.vlgmr.msra.gmra.mrb[4].mxu1 %vm894_vm2, %v891_v25 }
 0x123   : > { %1461 = vmatprep.mubr.msk.bf16.mxu1 %vm1734_vm0, %v1733_v0  ;;  %v967_v43 = vsel %vm965_vm5, %v893_v42, 0  ;;  %1460 = vmatpush3.bf16.msra.mxu1 %v1016_v52 }
 0x124   : > { %1454 = vmatpush3.bf16.msra.mxu0 %v967_v43 }
 0x1f5   : > { %v935_v30 = vpop.f32.mrb[4].mxu1 }
 0x1f6   : > { %v946_v31 = vsel %vm945_vm4, -1e+09, %v935_v30  ;;  %v1451_v32 = vpop.f32.mrb[5].mxu1 }
 0x1f7   : > { %v938_v33 = vpop.f32.mrb[6].mxu1  ;;  %v947_v34 = vsel %vm894_vm2, %v946_v31, -inf }
 0x1f8   : > { %948 = vmax.xlane.f32.xlu0 %v947_v34  ;;  %v1452_v35 = vpop.f32.mrb[7].mxu1 }
 0x285   : > { %v949_v44 = vpop.xlane.xlu0 %948 }
 0x286   : > { %v950_v45 = vsub.f32 %v946_v31, %v949_v44 }
 0x288   : > { %v951_v46 = vpack.c.bf16 %v950_v45, %v950_v45 }
 0x28a   : > { %v953_v47 = vmul.bf16 1069105081, %v951_v46 }
 0x28c   : > { %1575 = vpow.bf16 %v953_v47 }
 0x297   : > { %v1576_v48 = vpop.eup %1575 }
 0x298   : > { %1456 = vmatmul.mubr.msk.bf16.vlgmr.msra.gmra.mrb[8].mxu0 %vm894_vm2, %v1576_v48  ;;  %v955_v49 = vunpack.c.l.bf16 %v1576_v48 }
 0x29a   : > { %v956_v50 = vsel %vm894_vm2, %v955_v49, 0.0 }
 0x29b   : > { %957 = vadd.xlane.f32.xlu0 %v956_v50 }
 0x328   : > { %v958_v53 = vpop.xlane.xlu0 %957 }
 0x329   : > { %1577 = vrcp.f32 %v958_v53 }
 0x333   : > { %v1578_v54 = vpop.eup %1577 }
 0x334   : > { %v960_v55 = vmul.f32 %v1578_v54, %v955_v49 }
 0x336   : > { %961 = vst.msk [vmem:[%s2179_s14] sm:$0xff] %vm894_vm2, %v960_v55 }
 0x36b   : > { %v1003_v56 = vpop.f32.mrb[8].mxu0 }
 0x36c   : > { %v1009_v57 = vmul.f32 %v1578_v54, %v1003_v56  ;;  %v1457_v58 = vpop.f32.mrb[9].mxu0 }
 0x36d   : > { %v1006_v59 = vpop.f32.mrb[10].mxu0 }
 0x36e   : > { %v1010_v60 = vpack.c.bf16 %v1009_v57, %v1009_v57  ;;  %v1458_v61 = vpop.f32.mrb[11].mxu0 }
 0x370   : > { %1462 = vmatmul.mubr.msk.bf16.vlgmr.msra.gmra.mrb[8].mxu1 %vm894_vm2, %v1010_v60 }
 0x440   : > { %1061 = sbr.rel (%p1393_p6) target bundleno = 1095 (0x447), region = 80 }
 0x443   : > { %v1052_v62 = vpop.f32.mrb[8].mxu1 }
 0x444   : > { %v1463_v63 = vpop.f32.mrb[9].mxu1 }
 0x445   : > { %v1055_v0 = vpop.f32.mrb[10].mxu1 }
 0x446   : > { %v1464_v1 = vpop.f32.mrb[11].mxu1 }
 0x447 PF: > { %v1063_v3 = vld [vmem:[#allocation2] sm:$0xff]  ;;  %p1394_p8 = scmp.ne.s32.totalorder %s1715_s24, 3 }
 0x448   : > { %v1064_v4 = vadd.f32 %v1063_v3, %v1052_v62  ;;  %s2215_s16 = sld [smem:[#allocation26_spill]] (!%p1394_p8)  ;;  %s2216_s15 = sld [smem:[#allocation27_spill]] (!%p1394_p8) }
 0x449   : > { %1069 = sbr.rel (%p1394_p8) target bundleno = 1424 (0x590), region = 84  ;;  %s2217_s17 = sld [smem:[#allocation28_spill]] (!%p1394_p8) }
 0x44a   : > { %1065 = vst.msk [vmem:[#allocation2] sm:$0xff] %vm715_vm1, %v1064_v4 }
 0x44e   : > { %v1395_v7 = vld [vmem:[%s2215_s16] ss:$0 sm:$0xff] (!%p1394_p8) }
 0x44f   : > { %v1397_v21 = vld [vmem:[%s2217_s17] ss:$0 sm:$0xff] (!%p1394_p8) }
 0x451   : > { %v1070_v5 = vld [vmem:[#allocation2] sm:$0xff] }
 0x452   : > { %v1078_v8 = vadd.f32 %v1395_v7, %v1070_v5 }
 0x454   : > { %v1079_v9 = vadd.f32 %v1078_v8, %v1976_v6  ;;  %v1396_v6 = vld [vmem:[%s2216_s15] ss:$0 sm:$0xff] }
 0x456   : > { %v1080_v10 = vsel %vm715_vm1, %v1079_v9, 0.0 }
 0x457   : > { %1081 = vadd.xlane.f32.xlu0 %v1080_v10 }
 0x4e4   : > { %v1082_v11 = vpop.xlane.xlu0 %1081 }
 0x4e5   : > { %v1084_v12 = vmul.f32 0.03125, %v1082_v11 }
 0x4e7   : > { %v1085_v13 = vsub.f32 %v1079_v9, %v1084_v12 }
 0x4e9   : > { %v1086_v14 = vmul.f32 %v1085_v13, %v1085_v13 }
 0x4eb   : > { %v1087_v15 = vsel %vm715_vm1, %v1086_v14, 0.0 }
 0x4ec   : > { %1088 = vadd.xlane.f32.xlu0 %v1087_v15 }
 0x579   : > { %v1089_v16 = vpop.xlane.xlu0 %1088 }
 0x57a   : > { %v1090_v17 = vmul.f32 0.03125, %v1089_v16 }
 0x57c   : > { %v1091_v18 = vadd.f32 1e-05, %v1090_v17 }
 0x57e   : > { %1579 = vrsqrt.f32 %v1091_v18 }
 0x588   : > { %v1580_v19 = vpop.eup %1579 }
 0x589   : > { %v1093_v20 = vmul.f32 %v1580_v19, %v1085_v13 }
 0x58b   : > { %v1101_v22 = vmul.f32 %v1396_v6, %v1093_v20 }
 0x58d   : > { %v1109_v23 = vadd.f32 %v1397_v21, %v1101_v22 }
 0x58f   : > { %1110 = vst.msk [vmem:[%s633_s23] sm:$0xff] %vm715_vm1, %v1109_v23 }
 0x590 PF: > { %s1400_s4 = sshll.u32 %s1719_s25, 7  ;;  %s2219_s26 = sld [smem:[#allocation29_spill]] }
 0x591   : > { %s1130_s15 = sshll.u32 %s633_s23, 4  ;;  %s2221_s29 = sand.u32 1, %s1707_s22   ;;  %s1131_s15 = int_to_ptr.vmem [resolvable:$true] %s1130_s15 }
 0x592   : > { %s1112_s20 = scalar_lea.sflag [#allocation4], %s2221_s29  ;;  %s1581_s17 = scalar_lea.vmem %s1131_s15, 128 }
 0x593   : > { %p1582_p9 = scmp.ne.s32.totalorder %s1131_s15, %s1581_s17  ;;  %s1737_s14 = smov [#allocation3]  }
 0x594   : > { %s1585_s0 = sshll.u32 %s1737_s14, 4  ;;  %s1586_s0 = int_to_ptr.vmem [resolvable:$false] %s1585_s0 }
 0x595   : > { %p1583_p10 = pnand %p1582_p9, %p1890_p3  ;;  %s1587_s1 = scalar_lea.vmem %s1586_s0, 256 }
 0x596   : > { %s2220_s12 = smov %s2219_s26  ;;  %s2060_s27 = scalar_lea.hbm %s2219_s26, %s1400_s4 }
 0x597   : > { %p1584_p11 = pneg %p1583_p10  ;;  %p1588_p0 = scmp.lt.s32.totalorder %s1131_s15, %s1586_s0 }
 0x598   : > { %p1589_p1 = scmp.lt.s32.totalorder %s1587_s1, %s1581_s17 }
 0x59a   : > { %p1590_p4 = por %p1589_p1, %p1588_p0 }
 0x59c   : > { %p1591_p2 = pnand %p1590_p4, %p1584_p11 }
 0x59e   : > { %1594 = shalt.err (!%p1591_p2)
}
 0x59f   : > { %s1595_s11 = scalar_lea.hbm %s2060_s27, 128  ;;  %s1599_s14 = scalar_lea.hbm %s2220_s12, 256 }
 0x5a0   : > { %p1596_p5 = scmp.ne.s32.totalorder %s2060_s27, %s1595_s11  ;;  %p1600_p9 = scmp.lt.u32.totalorder %s2060_s27, %s2220_s12 }
 0x5a1   : > { %p1601_p10 = scmp.lt.u32.totalorder %s1599_s14, %s1595_s11  ;;  %p1603_p0 = scmp.lt.u32.totalorder %s1595_s11, %s2060_s27 }
 0x5a2   : > { %p1597_p6 = pnand %p1596_p5, %p1890_p3 }
 0x5a3   : > { %p1602_p11 = por %p1601_p10, %p1600_p9 }
 0x5a4   : > { %p1598_p8 = pneg %p1597_p6 }
 0x5a5   : > { %p1604_p1 = por %p1603_p0, %p1602_p11 }
 0x5a7   : > { %p1605_p4 = pnand %p1604_p1, %p1598_p8 }
 0x5a9   : > { %1608 = shalt.err (!%p1605_p4)
}
 0x5aa   : > { %1465 = dma.vmem_to_hbm [thread:$0]  (%p1890_p3), %s1131_s15, 128, %s2060_s27, %s1112_s20  }
 0x5ab   : > { %s1401_s1 = sshll.u32 %s1719_s25, 2  ;;  %s2222_s16 = scalar_lea.vmem [#allocation5], %s2029_s30 }
 0x5ac   : > { %s1145_s26 = sshll.u32 %s2222_s16, 4  ;;  %s1141_s29 = sadd.s32 %s1715_s24, %s1401_s1  ;;  %s2087_s26 = int_to_ptr.vmem [resolvable:$true] %s1145_s26 }
 0x5ad   : > { %s1402_s17 = sshll.u32 %s1141_s29, 7  ;;  %s2223_s21 = sld [smem:[#allocation30_spill]] }
 0x5ae   : > { %s2225_s6 = sand.u32 1, %s1695_s19   ;;  %s1609_s2 = scalar_lea.vmem %s2087_s26, 128 }
 0x5af   : > { %s1117_s0 = scalar_lea.sflag [#allocation6], %s2225_s6  ;;  %p1610_p2 = scmp.ne.s32.totalorder %s2087_s26, %s1609_s2 }
 0x5b0   : > { %s1738_s25 = smov [#allocation5]  }
 0x5b1   : > { %p1611_p3 = pnand %p1610_p2, %p1919_p12  ;;  %s1613_s30 = sshll.u32 %s1738_s25, 4  ;;  %s1614_s30 = int_to_ptr.vmem [resolvable:$false] %s1613_s30 }
 0x5b2   : > { %s1615_s24 = scalar_lea.vmem %s1614_s30, 256  ;;  %p1616_p6 = scmp.lt.s32.totalorder %s2087_s26, %s1614_s30 }
 0x5b3   : > { %s2224_s4 = smov %s2223_s21  ;;  %s1143_s14 = scalar_lea.hbm %s2223_s21, %s1402_s17 }
 0x5b4   : > { %p1612_p5 = pneg %p1611_p3  ;;  %p1617_p8 = scmp.lt.s32.totalorder %s1615_s24, %s1609_s2 }
 0x5b6   : > { %p1618_p9 = por %p1617_p8, %p1616_p6 }
 0x5b8   : > { %p1619_p10 = pnand %p1618_p9, %p1612_p5 }
 0x5ba   : > { %1622 = shalt.err (!%p1619_p10)
}
 0x5bb   : > { %s1623_s27 = scalar_lea.hbm %s1143_s14, 128  ;;  %s1627_s1 = scalar_lea.hbm %s2224_s4, 1024 }
 0x5bc   : > { %p1624_p11 = scmp.ne.s32.totalorder %s1143_s14, %s1623_s27  ;;  %p1628_p4 = scmp.lt.u32.totalorder %s1143_s14, %s2224_s4 }
 0x5bd   : > { %p1629_p2 = scmp.lt.u32.totalorder %s1627_s1, %s1623_s27  ;;  %p1631_p13 = scmp.lt.u32.totalorder %s1623_s27, %s1143_s14 }
 0x5be   : > { %p1625_p0 = pnand %p1624_p11, %p1919_p12 }
 0x5bf   : > { %p1630_p3 = por %p1629_p2, %p1628_p4 }
 0x5c0   : > { %p1626_p1 = pneg %p1625_p0 }
 0x5c1   : > { %p1632_p6 = por %p1631_p13, %p1630_p3 }
 0x5c3   : > { %p1633_p5 = pnand %p1632_p6, %p1626_p1 }
 0x5c5   : > { %1636 = shalt.err (!%p1633_p5)
}
 0x5c6   : > { %1466 = dma.vmem_to_hbm [thread:$0]  (%p1919_p12), %s2087_s26, 128, %s1143_s14, %s1117_s0  }
 0x5c7 PF: > { %s2226_s2 = sld [smem:[#allocation10_spill]]  ;;  %p1476_p8 = scmp.ge.s32.totalorder %s1731_s28, 2 }
 0x5c9   : > { %p1470_p9 = pnand %p1476_p8, %p1907_p7 }
 0x5cd   : > { %s1157_s17 = sand.u32 1, %s2226_s2  }
 0x5ce   : > { %s1158_s11 = scalar_lea.sflag [#allocation4], %s1157_s17 }
 0x5cf   : > { %1682 = dma.done.wait (!%p1470_p9), %s1158_s11, 128  }
 0x5d0   : > { %1684 = vsyncadd (!%p1470_p9), %s1158_s11, 4294967168  ;;  %s1166_s23 = sand.u32 1, %s1691_s18   ;;  %p2227_p13 = scmp.ne.s32.totalorder %s2207_s9, 0 }
 0x5d1   : > { %s1167_s21 = scalar_lea.sflag [#allocation6], %s1166_s23 }
 0x5d2   : > { %p1473_p10 = pnand %p1476_p8, %p2227_p13 }
 0x5d4   : > { %1686 = dma.done.wait (!%p1473_p10), %s1167_s21, 128  }
 0x5d5   : > { %1688 = vsyncadd (!%p1473_p10), %s1167_s21, 4294967168  ;;  %s32_s28 = sadd.s32 1, %s1731_s28   ;;  %s2228_s13 = sld [smem:[#allocation9_spill]] }
 0x5d6   : > { %p29_p12 = scmp.ge.s32.totalorder %s32_s28, 10   ;;  %s2229_s20 = sld [smem:[#allocation18_spill]] }
 0x5d7   : > { %s2230_s10 = sld [smem:[#allocation11_spill]]  ;;  %s2231_s23 = sld [smem:[#allocation17_spill]] }
 0x5d8   : > { %s2232_s24 = sld [smem:[#allocation12_spill]]  ;;  %s2233_s25 = sld [smem:[#allocation13_spill]] }
 0x5d9   : > { %s2234_s26 = sld [smem:[#allocation14_spill]]  ;;  %s2235_s27 = sld [smem:[#allocation16_spill]] }
 0x5da   : > { %s2236_s18 = smov %s1695_s19  ;;  %s2238_s21 = smov %s1707_s22 }
 0x5db   : > { %s2237_s19 = smov %s2228_s13  ;;  %31 = sbr.rel (!%p29_p12) target bundleno = 22 (0x16), region = 166 }
 0x5dd   : > { %s2239_s22 = smov %s2230_s10 }
 0x5e2   :  { %1172 = vsyncpa [#allocation4], 1 }
 0x5e3   :  { %1174 = vsyncpa [#allocation4 + $0x1], 1 }
 0x5e4   :  { %1175 = vsyncpa [#allocation6], 1 }
 0x5e5   :  { %1177 = vsyncpa [#allocation6 + $0x1], 1 }

</bundles_post_ra>
